<compile_context>
chip_gen: v6e
topology: v6e:2x2x1
jax: 0.10.0
libtpu: 0.0.40
codegen_flags: <defaults>
</compile_context>

<pallas_src>
import functools

import jax
import jax.numpy as jnp
from jax.experimental import pallas as pl
from jax.experimental.pallas import tpu as pltpu


def _round_up(x, m):
    return ((x + m - 1) // m) * m


def critic_kernel(x_ref, w1_ref, b1_ref, w2_ref, b2_ref, wq_ref, bq_ref, q_ref):
    # fc1: (tb, k_in) @ (k_in, fc1) on the MXU, f32 accumulation; bias+ReLU f32.
    h1 = jnp.dot(x_ref[...], w1_ref[...], preferred_element_type=jnp.float32)
    h1 = jnp.maximum(h1 + b1_ref[...], 0.0)
    # fc2: cast the f32 activation to the weight dtype (no-op for f32 weights,
    # cheap VPU cast for bf16) so the MXU sees matching operand dtypes.
    h2 = jnp.dot(h1.astype(w2_ref.dtype), w2_ref[...],
                 preferred_element_type=jnp.float32)
    h2 = jnp.maximum(h2 + b2_ref[...], 0.0)
    # q head (N=1): VPU multiply + lane reduction against the (1, fc2) row wq;
    # bq is an SMEM scalar.  Result stays in the natural (tb, 1) layout, so the
    # store is a plain masked vst -- no sublane->lane relayout.
    q = jnp.sum(h2 * wq_ref[...], axis=-1, keepdims=True) + bq_ref[0]
    q_ref[...] = q.astype(q_ref.dtype)


@functools.partial(jax.jit, static_argnames=("block_b", "use_bf16"))
def critic_forward(state, action, params, *, block_b=1024, use_bf16=True):
    """SAC critic forward pass: q(state, action) -> (B, 1)."""
    w1, b1, w2, b2, wq, bq = params
    B = state.shape[0]
    k_in = state.shape[1] + action.shape[1]
    fc1 = w1.shape[1]
    fc2 = w2.shape[1]

    # Fold torch.cat into the wrapper so fc1 is a single MXU matmul.
    x = jnp.concatenate(
        [state.astype(jnp.float32), action.astype(jnp.float32)], axis=1)

    # bf16 storage for the MXU operands; accumulation stays f32 in the kernel.
    mm_dtype = jnp.bfloat16 if use_bf16 else jnp.float32
    x = x.astype(mm_dtype)
    w1 = w1.astype(mm_dtype)
    w2 = w2.astype(mm_dtype)
    b1 = b1.astype(jnp.float32)
    b2 = b2.astype(jnp.float32)
    wq = wq.astype(jnp.float32)
    bq = bq.astype(jnp.float32)

    # Batch tiling:
    #  * B >= 128: 128-row-multiple tiles (full MXU rows on v5e) chosen so the
    #    grid has >= 2 tiles whenever B allows (keeps v7x's 2nd TC busy),
    #    capped at block_b (default 1024) to amortize per-grid-step overhead.
    #  * tiny B: one tile, rounded up to the sublane multiple (8).
    if B >= 128:
        tb = min(block_b, _round_up(pl.cdiv(B, 2), 128))
    else:
        tb = _round_up(B, 8)
    b_padded = _round_up(B, tb)
    n_tiles = b_padded // tb
    if b_padded != B:
        # Padded rows give relu(b) != 0 but are sliced off below (forward only).
        x = jnp.pad(x, ((0, b_padded - B), (0, 0)))

    const2 = lambda i: (0, 0)

    out = pl.pallas_call(
        critic_kernel,
        out_shape=jax.ShapeDtypeStruct((b_padded, 1), jnp.float32),
        grid=(n_tiles,),
        in_specs=[
            # activations: tiled over batch rows (double-buffered by Pallas)
            pl.BlockSpec((tb, k_in), lambda i: (i, 0)),
            # weights / biases: constant index_map -> DMA'd once, VMEM-resident
            pl.BlockSpec((k_in, fc1), const2),                   # W1
            pl.BlockSpec((1, fc1), const2),                      # b1
            pl.BlockSpec((fc1, fc2), const2),                    # W2
            pl.BlockSpec((1, fc2), const2),                      # b2
            pl.BlockSpec((1, fc2), const2),                      # wq (row)
            pl.BlockSpec(memory_space=pltpu.MemorySpace.SMEM),   # bq (scalar)
        ],
        out_specs=pl.BlockSpec((tb, 1), lambda i: (i, 0)),
        compiler_params=pltpu.CompilerParams(
            dimension_semantics=("parallel",)),   # v7x: shard tiles over 2 TCs
    )(x, w1, b1, w2, b2, wq, bq)

    return out[:B]


def init_params(key, input_dims, n_actions, fc1_dims=256, fc2_dims=256):
    """PyTorch nn.Linear-style init: U[-1/sqrt(fan_in), 1/sqrt(fan_in)].

    Weights are stored transposed, (in_features, out_features), so the kernel
    computes x @ W directly on the MXU. wq is stored as a (1, fc2) row for the
    VPU q-head reduction; bq is a (1,) scalar passed via SMEM.
    """
    in_dim = input_dims[0]
    k_in = in_dim + n_actions
    ks = jax.random.split(key, 6)

    def uni(k, shape, fan_in):
        bound = 1.0 / (fan_in ** 0.5)
        return jax.random.uniform(k, shape, jnp.float32, -bound, bound)

    w1 = uni(ks[0], (k_in, fc1_dims), k_in)
    b1 = uni(ks[1], (1, fc1_dims), k_in)
    w2 = uni(ks[2], (fc1_dims, fc2_dims), fc1_dims)
    b2 = uni(ks[3], (1, fc2_dims), fc1_dims)
    wq = uni(ks[4], (1, fc2_dims), fc2_dims)
    bq = uni(ks[5], (1,), fc2_dims)
    return (w1, b1, w2, b2, wq, bq)


def reference_forward(state, action, params):
    """Pure-JAX reference matching the PyTorch forward (f32, HIGHEST precision)."""
    w1, b1, w2, b2, wq, bq = params
    dot = functools.partial(jnp.dot, precision=jax.lax.Precision.HIGHEST)
    x = jnp.concatenate([state, action], axis=1)
    h1 = jnp.maximum(dot(x, w1) + b1, 0.0)
    h2 = jnp.maximum(dot(h1, w2) + b2, 0.0)
    return dot(h2, wq.T) + bq


if __name__ == "__main__":
    # Small shapes consistent with the module: input_dims=[16], n_actions=4.
    batch, in_dim, n_actions = 8, 16, 4
    fc1_dims, fc2_dims = 256, 256

    key = jax.random.PRNGKey(0)
    k_state, k_action, k_params = jax.random.split(key, 3)

    state = jax.random.normal(k_state, (batch, in_dim), jnp.float32)
    action = jax.random.normal(k_action, (batch, n_actions), jnp.float32)
    params = init_params(k_params, [in_dim], n_actions, fc1_dims, fc2_dims)

    q_ref = reference_forward(state, action, params)

    # f32 path: tight tolerance against the pure-JAX / PyTorch-equivalent ref.
    q32 = jax.block_until_ready(
        critic_forward(state, action, params, use_bf16=False))
    assert q32.shape == (batch, 1), q32.shape
    assert jnp.allclose(q32, q_ref, atol=1e-4, rtol=1e-4), (q32, q_ref)

    # Default bf16-matmul path (f32 accumulation): documented looser tolerance.
    qbf = jax.block_until_ready(critic_forward(state, action, params))
    assert qbf.shape == (batch, 1), qbf.shape
    assert jnp.allclose(qbf, q_ref, atol=5e-2, rtol=5e-2), (qbf, q_ref)

    # Exercise the multi-tile grid + batch-padding path: B=300 -> tb=256,
    # padded to 512 rows, 2 "parallel" grid tiles.
    b2_ = 300
    s2 = jax.random.normal(jax.random.PRNGKey(1), (b2_, in_dim), jnp.float32)
    a2 = jax.random.normal(jax.random.PRNGKey(2), (b2_, n_actions), jnp.float32)
    q2_ref = reference_forward(s2, a2, params)
    q2_32 = jax.block_until_ready(critic_forward(s2, a2, params, use_bf16=False))
    assert q2_32.shape == (b2_, 1), q2_32.shape
    assert jnp.allclose(q2_32, q2_ref, atol=1e-4, rtol=1e-4)
    q2_bf = jax.block_until_ready(critic_forward(s2, a2, params))
    assert q2_bf.shape == (b2_, 1), q2_bf.shape
    assert jnp.allclose(q2_bf, q2_ref, atol=5e-2, rtol=5e-2)

    # Tiny-batch path (single round-up-to-8 tile): B=10 -> tb=16.
    b3_ = 10
    s3 = jax.random.normal(jax.random.PRNGKey(3), (b3_, in_dim), jnp.float32)
    a3 = jax.random.normal(jax.random.PRNGKey(4), (b3_, n_actions), jnp.float32)
    q3 = jax.block_until_ready(critic_forward(s3, a3, params, use_bf16=False))
    q3_ref = reference_forward(s3, a3, params)
    assert q3.shape == (b3_, 1), q3.shape
    assert jnp.allclose(q3, q3_ref, atol=1e-4, rtol=1e-4)

    print("KERNEL_OK")
</pallas_src>

<mosaic_0001>
module attributes {stable_mosaic.version = 11 : i64} {
  func.func @critic_kernel(%arg0: i32, %arg1: memref<8x20xf32, #tpu.memory_space<vmem>>, %arg2: memref<20x256xf32, #tpu.memory_space<vmem>>, %arg3: memref<1x256xf32, #tpu.memory_space<vmem>>, %arg4: memref<256x256xf32, #tpu.memory_space<vmem>>, %arg5: memref<1x256xf32, #tpu.memory_space<vmem>>, %arg6: memref<1x256xf32, #tpu.memory_space<vmem>>, %arg7: memref<1xf32, #tpu.memory_space<smem>>, %arg8: memref<8x1xf32, #tpu.memory_space<vmem>>) attributes {dimension_semantics = [#tpu.dimension_semantics<parallel>], iteration_bounds = array<i64: 1>, scalar_prefetch = 0 : i64, scratch_operands = 0 : i64, tpu.core_type = #tpu.core_type<tc>, window_params = [{transform_indices = @transform_0, window_bounds = array<i64: 8, 20>}, {pipeline_mode = #tpu.pipeline_mode<synchronous>, transform_indices = @transform_1, window_bounds = array<i64: 20, 256>}, {pipeline_mode = #tpu.pipeline_mode<synchronous>, transform_indices = @transform_2, window_bounds = array<i64: 1, 256>}, {pipeline_mode = #tpu.pipeline_mode<synchronous>, transform_indices = @transform_3, window_bounds = array<i64: 256, 256>}, {pipeline_mode = #tpu.pipeline_mode<synchronous>, transform_indices = @transform_4, window_bounds = array<i64: 1, 256>}, {pipeline_mode = #tpu.pipeline_mode<synchronous>, transform_indices = @transform_5, window_bounds = array<i64: 1, 256>}, {transform_indices = @transform_6, window_bounds = array<i64: 1>}, {transform_indices = @transform_7, window_bounds = array<i64: 8, 1>}]} {
    %c0 = arith.constant 0 : index
    %c0_0 = arith.constant 0 : index
    %0 = vector.load %arg1[%c0, %c0_0] : memref<8x20xf32, #tpu.memory_space<vmem>>, vector<8x20xf32>
    %c0_1 = arith.constant 0 : index
    %c0_2 = arith.constant 0 : index
    %1 = vector.load %arg2[%c0_1, %c0_2] : memref<20x256xf32, #tpu.memory_space<vmem>>, vector<20x256xf32>
    %cst = arith.constant dense<0.000000e+00> : vector<8x256xf32>
    %2 = tpu.matmul %0, %1, %cst {dimension_numbers = #tpu.dot_dimension_numbers<[1], [0], [0], [1], [0, 0, 1, 1], [], []>} : vector<8x20xf32>, vector<20x256xf32>, vector<8x256xf32> -> vector<8x256xf32>
    %c0_3 = arith.constant 0 : index
    %c0_4 = arith.constant 0 : index
    %3 = vector.load %arg3[%c0_3, %c0_4] : memref<1x256xf32, #tpu.memory_space<vmem>>, vector<1x256xf32>
    %4 = vector.broadcast %3 : vector<1x256xf32> to vector<8x256xf32>
    %5 = arith.addf %2, %4 : vector<8x256xf32>
    %cst_5 = arith.constant 0.000000e+00 : f32
    %6 = vector.broadcast %cst_5 : f32 to vector<8x256xf32>
    %7 = arith.maximumf %5, %6 : vector<8x256xf32>
    %c0_6 = arith.constant 0 : index
    %c0_7 = arith.constant 0 : index
    %8 = vector.load %arg4[%c0_6, %c0_7] : memref<256x256xf32, #tpu.memory_space<vmem>>, vector<256x256xf32>
    %cst_8 = arith.constant dense<0.000000e+00> : vector<8x256xf32>
    %9 = tpu.matmul %7, %8, %cst_8 {dimension_numbers = #tpu.dot_dimension_numbers<[1], [0], [0], [1], [0, 0, 1, 1], [], []>} : vector<8x256xf32>, vector<256x256xf32>, vector<8x256xf32> -> vector<8x256xf32>
    %c0_9 = arith.constant 0 : index
    %c0_10 = arith.constant 0 : index
    %10 = vector.load %arg5[%c0_9, %c0_10] : memref<1x256xf32, #tpu.memory_space<vmem>>, vector<1x256xf32>
    %11 = vector.broadcast %10 : vector<1x256xf32> to vector<8x256xf32>
    %12 = arith.addf %9, %11 : vector<8x256xf32>
    %cst_11 = arith.constant 0.000000e+00 : f32
    %13 = vector.broadcast %cst_11 : f32 to vector<8x256xf32>
    %14 = arith.maximumf %12, %13 : vector<8x256xf32>
    %c0_12 = arith.constant 0 : index
    %c0_13 = arith.constant 0 : index
    %15 = vector.load %arg6[%c0_12, %c0_13] : memref<1x256xf32, #tpu.memory_space<vmem>>, vector<1x256xf32>
    %16 = vector.broadcast %15 : vector<1x256xf32> to vector<8x256xf32>
    %17 = arith.mulf %14, %16 : vector<8x256xf32>
    %cst_14 = arith.constant dense<0.000000e+00> : vector<8xf32>
    %18 = vector.multi_reduction <add>, %17, %cst_14 [1] : vector<8x256xf32> to vector<8xf32>
    %19 = vector.shape_cast %18 : vector<8xf32> to vector<8x1xf32>
    %c0_15 = arith.constant 0 : index
    %20 = memref.load %arg7[%c0_15] : memref<1xf32, #tpu.memory_space<smem>>
    %21 = vector.broadcast %20 : f32 to vector<8x1xf32>
    %22 = arith.addf %19, %21 : vector<8x1xf32>
    %c0_16 = arith.constant 0 : index
    %c0_17 = arith.constant 0 : index
    %23 = vector.load %arg8[%c0_16, %c0_17] : memref<8x1xf32, #tpu.memory_space<vmem>>, vector<8x1xf32>
    tpu.vector_store %arg8[%c0_16, %c0_17], %22 {strides = array<i32>} : memref<8x1xf32, #tpu.memory_space<vmem>>, vector<8x1xf32>,
    return
  }
  func.func @transform_0(%arg0: i32) -> (i32, i32) {
    %c0_i32 = arith.constant 0 : i32
    %c0_i32_0 = arith.constant 0 : i32
    return %arg0, %c0_i32 : i32, i32
  }
  func.func @transform_1(%arg0: i32) -> (i32, i32) {
    %c0_i32 = arith.constant 0 : i32
    %c0_i32_0 = arith.constant 0 : i32
    %c0_i32_1 = arith.constant 0 : i32
    return %c0_i32, %c0_i32_0 : i32, i32
  }
  func.func @transform_2(%arg0: i32) -> (i32, i32) {
    %c0_i32 = arith.constant 0 : i32
    %c0_i32_0 = arith.constant 0 : i32
    %c0_i32_1 = arith.constant 0 : i32
    return %c0_i32, %c0_i32_0 : i32, i32
  }
  func.func @transform_3(%arg0: i32) -> (i32, i32) {
    %c0_i32 = arith.constant 0 : i32
    %c0_i32_0 = arith.constant 0 : i32
    %c0_i32_1 = arith.constant 0 : i32
    return %c0_i32, %c0_i32_0 : i32, i32
  }
  func.func @transform_4(%arg0: i32) -> (i32, i32) {
    %c0_i32 = arith.constant 0 : i32
    %c0_i32_0 = arith.constant 0 : i32
    %c0_i32_1 = arith.constant 0 : i32
    return %c0_i32, %c0_i32_0 : i32, i32
  }
  func.func @transform_5(%arg0: i32) -> (i32, i32) {
    %c0_i32 = arith.constant 0 : i32
    %c0_i32_0 = arith.constant 0 : i32
    %c0_i32_1 = arith.constant 0 : i32
    return %c0_i32, %c0_i32_0 : i32, i32
  }
  func.func @transform_6(%arg0: i32) -> i32 {
    %c0_i32 = arith.constant 0 : i32
    %c0_i32_0 = arith.constant 0 : i32
    return %c0_i32 : i32
  }
  func.func @transform_7(%arg0: i32) -> (i32, i32) {
    %c0_i32 = arith.constant 0 : i32
    %c0_i32_0 = arith.constant 0 : i32
    return %arg0, %c0_i32 : i32, i32
  }
}

</mosaic_0001>

<bundles_post_ra>
// kernel: critic_forward.1
= control target key start
LH: loop header
LB: loop body
LE: loop exit
PB: predicated region body
PF: predicated region fallthrough
CT: control target
= control target key end

     0   :  { %13 = vsyncpa [#allocation4], 0  ;;  %s456_s0 = inlined_call_operand.vmem [shape: f32[8,20], index: 0, kind: input, shape index: {}]   ;;  %s457_s1 = inlined_call_operand.hbm [shape: f32[20,256], index: 1, kind: input, shape index: {}]   ;;  %s458_s2 = inlined_call_operand.vmem [shape: f32[1,256], index: 2, kind: input, shape index: {}]   ;;  %s459_s3 = inlined_call_operand.hbm [shape: f32[256,256], index: 3, kind: input, shape index: {}]   ;;  %s460_s4 = inlined_call_operand.vmem [shape: f32[1,256], index: 4, kind: input, shape index: {}]   ;;  %s461_s5 = inlined_call_operand.vmem [shape: f32[1,256], index: 5, kind: input, shape index: {}]   ;;  %s462_s6 = inlined_call_operand.<no memory space> [shape: f32[1], index: 6, kind: input, shape index: {}]   ;;  %s463_s7 = inlined_call_operand.vmem [shape: f32[8,1], index: 7, kind: output, shape index: {}]  }
   0x1   :  { %14 = vsyncpa [#allocation6], 0  ;;  %s387_s24 = smov [#allocation3]  }
   0x2   :  { %s22_s25 = sshll.u32 %s387_s24, 4  ;;  %s23_s25 = int_to_ptr.vmem [resolvable:$true] %s22_s25 }
   0x3   :  { %s351_s26 = scalar_lea.vmem %s23_s25, 768  ;;  %p356_p1 = scmp.lt.s32.totalorder %s23_s25, %s23_s25 }
   0x4   :  { %p352_p0 = scmp.ne.s32.totalorder %s23_s25, %s351_s26  ;;  %p357_p2 = scmp.lt.s32.totalorder %s351_s26, %s351_s26 }
   0x6   :  { %p358_p3 = por %p357_p2, %p356_p1 }
   0x8   :  { %p359_p4 = pnand %p358_p3, %p352_p0 }
   0xa   :  { %362 = shalt.err (!%p359_p4)
}
   0xb   :  { %s388_s27 = smov 256   ;;  %s389_s28 = smov 16  }
   0xc   :  { %28 = dma.hbm_to_vmem [thread:$0]  %s457_s1, 768, %s23_s25, [#allocation4], %s388_s27, %s388_s27, %s389_s28  }
   0xd   :  { %s390_s8 = smov [#allocation5]  }
   0xe   :  { %s36_s9 = sshll.u32 %s390_s8, 4  ;;  %s37_s9 = int_to_ptr.vmem [resolvable:$true] %s36_s9 }
   0xf   :  { %s371_s10 = scalar_lea.vmem %s37_s9, 8192  ;;  %p376_p6 = scmp.lt.s32.totalorder %s37_s9, %s37_s9 }
  0x10   :  { %p372_p5 = scmp.ne.s32.totalorder %s37_s9, %s371_s10  ;;  %p377_p7 = scmp.lt.s32.totalorder %s371_s10, %s371_s10 }
  0x12   :  { %p378_p8 = por %p377_p7, %p376_p6 }
  0x14   :  { %p379_p9 = pnand %p378_p8, %p372_p5 }
  0x16   :  { %382 = shalt.err (!%p379_p9)
}
  0x17   :  { %42 = dma.hbm_to_vmem [thread:$0]  %s459_s3, 8192, %s37_s9, [#allocation6], %s388_s27, %s388_s27, %s389_s28  }
  0x18   :  { %383 = dma.done.wait [#allocation4], 768  }
  0x19   :  { %384 = vsyncadd [#allocation4], 4294966528 }
  0x1a   :  { %385 = dma.done.wait [#allocation6], 8192  }
  0x1b   :  { %386 = vsyncadd [#allocation6], 4294959104  ;;  %v391_v0 = vmov 0.0   ;;  %vm78_vm0 = vcmask 1043456   ;;  %v61_v1 = vld [vmem:[#allocation3 + $0x28] sm:$0xf] }
  0x1c   :  { %149 = vmatprep.mubr.f32.mxu0 %v391_v0  ;;  %v60_v2 = vld [vmem:[#allocation3 + $0x20] sm:$0xf]  ;;  %v59_v3 = vld [vmem:[#allocation3 + $0x18] sm:$0xff]  ;;  %335 = vmatprep.subr.msk.mxu0 %vm78_vm0, %v61_v1  ;;  %v58_v4 = vld [vmem:[#allocation3 + $0x10] sm:$0xff]  ;;  %vm74_vm1 = vcmask 162816   ;;  %vm327_vm2 = vcmask 7168  }
  0x1d   :  { %336 = vmatpush1.msk.msra.mxu0 %vm78_vm0, %v60_v2  ;;  %v57_v5 = vld [vmem:[#allocation3 + $0x8] sm:$0xff]  ;;  %v188_v7 = vld [vmem:[#allocation5 + $0xf0] sm:$0xff]  ;;  %v187_v9 = vld [vmem:[#allocation5 + $0xe8] sm:$0xff] }
  0x1e   :  { %v189_v6 = vld [vmem:[#allocation5 + $0xf8] sm:$0xff]  ;;  %113 = vmatprep.subr.mxu0 %v59_v3  ;;  %v56_v8 = vld [vmem:[#allocation3] sm:$0xff]  ;;  %v186_v10 = vld [vmem:[#allocation5 + $0xe0] sm:$0xff] }
  0x1f   :  { %234 = vmatprep.subr.mxu1 %v189_v6  ;;  %114 = vmatpush1.msra.mxu0 %v58_v4  ;;  %v55_v11 = vld [vmem:[%s456_s0] sm:$0xff]  ;;  %v185_v12 = vld [vmem:[#allocation5 + $0xd8] sm:$0xff]  ;;  %v183_v14 = vld [vmem:[#allocation5 + $0xc8] sm:$0xff] }
  0x20   :  { %235 = vmatpush1.msra.mxu1 %v188_v7  ;;  %115 = vmatprep.subr.mxu0 %v57_v5  ;;  %v184_v13 = vld [vmem:[#allocation5 + $0xd0] sm:$0xff]  ;;  %v182_v15 = vld [vmem:[#allocation5 + $0xc0] sm:$0xff]  ;;  %v181_v16 = vld [vmem:[#allocation5 + $0xb8] sm:$0xff] }
  0x21   :  { %236 = vmatprep.subr.mxu1 %v187_v9  ;;  %116 = vmatpush1.msra.mxu0 %v56_v8  ;;  %v180_v17 = vld [vmem:[#allocation5 + $0xb0] sm:$0xff]  ;;  %v179_v18 = vld [vmem:[#allocation5 + $0xa8] sm:$0xff]  ;;  %v178_v19 = vld [vmem:[#allocation5 + $0xa0] sm:$0xff]  ;;  %v64_v8 = vlaneseq }
  0x22   :  { %237 = vmatpush1.msra.mxu1 %v186_v10  ;;  %337 = vmatmul.mubr.msk.f32.vlgmr.msra.gmra.mxu0 %vm74_vm1, %v55_v11  ;;  %v177_v20 = vld [vmem:[#allocation5 + $0x98] sm:$0xff]  ;;  %v176_v21 = vld [vmem:[#allocation5 + $0x90] sm:$0xff]  ;;  %v175_v22 = vld [vmem:[#allocation5 + $0x88] sm:$0xff] }
  0x23   :  { %238 = vmatprep.subr.mxu1 %v185_v12  ;;  %v174_v23 = vld [vmem:[#allocation5 + $0x80] sm:$0xff]  ;;  %v173_v24 = vld [vmem:[#allocation5 + $0x78] sm:$0xff]  ;;  %v172_v25 = vld [vmem:[#allocation5 + $0x70] sm:$0xff]  ;;  %v65_v9 = vshrl.u32 %v64_v8, 7 }
  0x24   :  { %239 = vmatpush1.msra.mxu1 %v184_v13  ;;  %v171_v26 = vld [vmem:[#allocation5 + $0x68] sm:$0xff]  ;;  %v170_v27 = vld [vmem:[#allocation5 + $0x60] sm:$0xff]  ;;  %v169_v28 = vld [vmem:[#allocation5 + $0x58] sm:$0xff] }
  0x25   :  { %240 = vmatprep.subr.mxu1 %v183_v14  ;;  %v168_v29 = vld [vmem:[#allocation5 + $0x50] sm:$0xff]  ;;  %v167_v30 = vld [vmem:[#allocation5 + $0x48] sm:$0xff]  ;;  %v166_v31 = vld [vmem:[#allocation5 + $0x40] sm:$0xff]  ;;  %v66_v10 = vsub.s32 0, %v65_v9  ;;  %v70_v12 = vsub.s32 1, %v65_v9 }
  0x26   :  { %241 = vmatpush1.msra.mxu1 %v182_v15  ;;  %v165_v32 = vld [vmem:[#allocation5 + $0x38] sm:$0xff]  ;;  %v164_v33 = vld [vmem:[#allocation5 + $0x30] sm:$0xff]  ;;  %v163_v34 = vld [vmem:[#allocation5 + $0x28] sm:$0xff] }
  0x27   :  { %242 = vmatprep.subr.mxu1 %v181_v16  ;;  %v162_v35 = vld [vmem:[#allocation5 + $0x20] sm:$0xff]  ;;  %v161_v36 = vld [vmem:[#allocation5 + $0x18] sm:$0xff]  ;;  %v160_v37 = vld [vmem:[#allocation5 + $0x10] sm:$0xff] }
  0x28   :  { %243 = vmatpush1.msra.mxu1 %v180_v17  ;;  %v159_v38 = vld [vmem:[#allocation5 + $0x8] sm:$0xff]  ;;  %v158_v39 = vld [vmem:[#allocation5] sm:$0xff]  ;;  %v221_v40 = vld [vmem:[#allocation5 + $0x1f8] sm:$0xff] }
  0x29   :  { %244 = vmatprep.subr.mxu1 %v179_v18  ;;  %v220_v41 = vld [vmem:[#allocation5 + $0x1f0] sm:$0xff]  ;;  %v219_v42 = vld [vmem:[#allocation5 + $0x1e8] sm:$0xff]  ;;  %v218_v43 = vld [vmem:[#allocation5 + $0x1e0] sm:$0xff] }
  0x2a   :  { %245 = vmatpush1.msra.mxu1 %v178_v19  ;;  %v217_v44 = vld [vmem:[#allocation5 + $0x1d8] sm:$0xff]  ;;  %v216_v45 = vld [vmem:[#allocation5 + $0x1d0] sm:$0xff]  ;;  %v215_v46 = vld [vmem:[#allocation5 + $0x1c8] sm:$0xff] }
  0x2b   :  { %246 = vmatprep.subr.mxu1 %v177_v20  ;;  %v214_v47 = vld [vmem:[#allocation5 + $0x1c0] sm:$0xff]  ;;  %v213_v48 = vld [vmem:[#allocation5 + $0x1b8] sm:$0xff]  ;;  %v212_v49 = vld [vmem:[#allocation5 + $0x1b0] sm:$0xff] }
  0x2c   :  { %247 = vmatpush1.msra.mxu1 %v176_v21  ;;  %v211_v50 = vld [vmem:[#allocation5 + $0x1a8] sm:$0xff]  ;;  %v210_v51 = vld [vmem:[#allocation5 + $0x1a0] sm:$0xff]  ;;  %v209_v52 = vld [vmem:[#allocation5 + $0x198] sm:$0xff] }
  0x2d   :  { %248 = vmatprep.subr.mxu1 %v175_v22  ;;  %v208_v53 = vld [vmem:[#allocation5 + $0x190] sm:$0xff]  ;;  %v207_v54 = vld [vmem:[#allocation5 + $0x188] sm:$0xff]  ;;  %v206_v55 = vld [vmem:[#allocation5 + $0x180] sm:$0xff] }
  0x2e   :  { %249 = vmatpush1.msra.mxu1 %v174_v23  ;;  %v205_v56 = vld [vmem:[#allocation5 + $0x178] sm:$0xff]  ;;  %v204_v57 = vld [vmem:[#allocation5 + $0x170] sm:$0xff]  ;;  %v203_v58 = vld [vmem:[#allocation5 + $0x168] sm:$0xff] }
  0x2f   :  { %250 = vmatprep.subr.mxu1 %v173_v24  ;;  %v202_v59 = vld [vmem:[#allocation5 + $0x160] sm:$0xff]  ;;  %v201_v60 = vld [vmem:[#allocation5 + $0x158] sm:$0xff]  ;;  %v200_v61 = vld [vmem:[#allocation5 + $0x150] sm:$0xff] }
  0x30   :  { %251 = vmatpush1.msra.mxu1 %v172_v25  ;;  %v199_v62 = vld [vmem:[#allocation5 + $0x148] sm:$0xff]  ;;  %v198_v63 = vld [vmem:[#allocation5 + $0x140] sm:$0xff]  ;;  %v197_v0 = vld [vmem:[#allocation5 + $0x138] sm:$0xff] }
  0x31   :  { %252 = vmatprep.subr.mxu1 %v171_v26  ;;  %v196_v1 = vld [vmem:[#allocation5 + $0x130] sm:$0xff]  ;;  %v195_v2 = vld [vmem:[#allocation5 + $0x128] sm:$0xff]  ;;  %v194_v3 = vld [vmem:[#allocation5 + $0x120] sm:$0xff] }
  0x32   :  { %253 = vmatpush1.msra.mxu1 %v170_v27  ;;  %v193_v4 = vld [vmem:[#allocation5 + $0x118] sm:$0xff]  ;;  %v192_v5 = vld [vmem:[#allocation5 + $0x110] sm:$0xff]  ;;  %v191_v6 = vld [vmem:[#allocation5 + $0x108] sm:$0xff] }
  0x33   :  { %254 = vmatprep.subr.mxu1 %v169_v28  ;;  %v190_v7 = vld [vmem:[#allocation5 + $0x100] sm:$0xff]  ;;  %v62_v11 = vld [vmem:[%s458_s2] sm:$0x3] }
  0x34   :  { %255 = vmatpush1.msra.mxu1 %v168_v29  ;;  %v67_v13 = vrot.slane %v62_v11, %v66_v10  ;;  %v71_v14 = vrot.slane %v62_v11, %v70_v12  ;;  %v222_v21 = vld [vmem:[%s460_s4] sm:$0x3] }
  0x35   :  { %256 = vmatprep.subr.mxu1 %v167_v30  ;;  %v227_v22 = vrot.slane %v222_v21, %v66_v10  ;;  %v231_v23 = vrot.slane %v222_v21, %v70_v12  ;;  %v307_v25 = vld [vmem:[%s461_s5] sm:$0x3] }
  0x36   :  { %257 = vmatpush1.msra.mxu1 %v166_v31  ;;  %v312_v30 = vrot.slane %v307_v25, %v66_v10  ;;  %v316_v31 = vrot.slane %v307_v25, %v70_v12 }
  0x37   :  { %258 = vmatprep.subr.mxu1 %v165_v32 }
  0x38   :  { %259 = vmatpush1.msra.mxu1 %v164_v33 }
  0x39   :  { %260 = vmatprep.subr.mxu1 %v163_v34 }
  0x3a   :  { %261 = vmatpush1.msra.mxu1 %v162_v35 }
  0x3b   :  { %262 = vmatprep.subr.mxu1 %v161_v36  ;;  %v325_v36 = vstv %s462_s6 }
  0x3c   :  { %263 = vmatpush1.msra.mxu1 %v160_v37 }
  0x3d   :  { %264 = vmatprep.subr.mxu1 %v159_v38 }
  0x3e   :  { %265 = vmatpush1.msra.mxu1 %v158_v39 }
  0x3f   :  { %266 = vmatprep.subr.mxu1 %v221_v40 }
  0x40   :  { %267 = vmatpush2.msra.mxu1 %v220_v41 }
  0x41   :  { %268 = vmatprep.subr.mxu1 %v219_v42 }
  0x42   :  { %269 = vmatpush2.msra.mxu1 %v218_v43 }
  0x43   :  { %270 = vmatprep.subr.mxu1 %v217_v44 }
  0x44   :  { %271 = vmatpush2.msra.mxu1 %v216_v45 }
  0x45   :  { %272 = vmatprep.subr.mxu1 %v215_v46 }
  0x46   :  { %273 = vmatpush2.msra.mxu1 %v214_v47 }
  0x47   :  { %274 = vmatprep.subr.mxu1 %v213_v48 }
  0x48   :  { %275 = vmatpush2.msra.mxu1 %v212_v49 }
  0x49   :  { %276 = vmatprep.subr.mxu1 %v211_v50 }
  0x4a   :  { %277 = vmatpush2.msra.mxu1 %v210_v51 }
  0x4b   :  { %278 = vmatprep.subr.mxu1 %v209_v52 }
  0x4c   :  { %279 = vmatpush2.msra.mxu1 %v208_v53 }
  0x4d   :  { %280 = vmatprep.subr.mxu1 %v207_v54 }
  0x4e   :  { %281 = vmatpush2.msra.mxu1 %v206_v55 }
  0x4f   :  { %282 = vmatprep.subr.mxu1 %v205_v56 }
  0x50   :  { %283 = vmatpush2.msra.mxu1 %v204_v57 }
  0x51   :  { %284 = vmatprep.subr.mxu1 %v203_v58 }
  0x52   :  { %285 = vmatpush2.msra.mxu1 %v202_v59 }
  0x53   :  { %286 = vmatprep.subr.mxu1 %v201_v60 }
  0x54   :  { %287 = vmatpush2.msra.mxu1 %v200_v61 }
  0x55   :  { %288 = vmatprep.subr.mxu1 %v199_v62 }
  0x56   :  { %289 = vmatpush2.msra.mxu1 %v198_v63 }
  0x57   :  { %290 = vmatprep.subr.mxu1 %v197_v0 }
  0x58   :  { %291 = vmatpush2.msra.mxu1 %v196_v1 }
  0x59   :  { %292 = vmatprep.subr.mxu1 %v195_v2 }
  0x5a   :  { %293 = vmatpush2.msra.mxu1 %v194_v3 }
  0x5b   :  { %294 = vmatprep.subr.mxu1 %v193_v4 }
  0x5c   :  { %295 = vmatpush2.msra.mxu1 %v192_v5 }
  0x5d   :  { %296 = vmatprep.subr.mxu1 %v191_v6 }
  0x5e   :  { %297 = vmatpush2.msra.mxu1 %v190_v7 }
  0xe2   :  { %v151_v15 = vpop.f32.mrf.mxu0 }
  0xe3   :  { %v152_v16 = vadd.f32 %v151_v15, %v67_v13 }
  0xe4   :  { %v153_v17 = vpop.f32.mrf.mxu0 }
  0xe5   :  { %v154_v18 = vadd.f32 %v153_v17, %v71_v14  ;;  %v156_v20 = vmax.f32 %v152_v16, 0.0 }
  0xe7   :  { %v157_v19 = vmax.f32 %v154_v18, 0.0 }
  0xe9   :  { %298 = vmatprep.mubr.f32.mxu1 %v157_v19 }
  0xea   :  { %299 = vmatmul.mubr.f32.vlgmr.msra.gmra.mxu1 %v156_v20 }
 0x1aa   :  { %v300_v24 = vpop.f32.mrf.mxu1 }
 0x1ab   :  { %v301_v26 = vadd.f32 %v300_v24, %v227_v22 }
 0x1ac   :  { %v302_v27 = vpop.f32.mrf.mxu1 }
 0x1ad   :  { %v305_v28 = vmax.f32 %v301_v26, 0.0  ;;  %v303_v29 = vadd.f32 %v302_v27, %v231_v23 }
 0x1af   :  { %v306_v32 = vmax.f32 %v303_v29, 0.0  ;;  %v319_v33 = vmul.f32 %v312_v30, %v305_v28 }
 0x1b1   :  { %v320_v34 = vmul.f32 %v316_v31, %v306_v32 }
 0x1b3   :  { %v321_v35 = vadd.f32 %v320_v34, %v319_v33 }
 0x1b5   :  { %322 = vadd.xlane.f32.xlu0 %v321_v35 }
 0x23e   :  { %v323_v37 = vpop.xlane.xlu0 %322 }
 0x23f   :  { %v326_v38 = vadd.f32 %v325_v36, %v323_v37 }
 0x241   :  { %328 = vst.msk [vmem:[%s463_s7] sm:$0xff] %vm327_vm2, %v326_v38 }
 0x242   :  { %333 = vsyncpa [#allocation4], 1 }
 0x243   :  { %334 = vsyncpa [#allocation6], 1 }

</bundles_post_ra>
